<compile_context>
chip_gen: v7x
topology: tpu7x:2x2x1
jax: 0.10.0
libtpu: 0.0.40
codegen_flags: <defaults>
</compile_context>

<pallas_src>
import numpy as np
import jax
import jax.numpy as jnp
from jax.experimental import pallas as pl
from jax.experimental.pallas import tpu as pltpu

# Hard-coded grid-normalization divisors from the PyTorch reference
# (boxes[..., 0] /= 44 ; boxes[..., 1] /= 16 ; boxes[..., 2] /= 44 ; /= 16).
_GRID_DIV = (44.0, 16.0, 44.0, 16.0)

# Sublane-groups per grid step (tile = _TARGET_S * 128 lanes = 32768 boxes).
# Must be a multiple of 8 when tiling; small maps use one full-extent tile.
_TARGET_S = 256


def _detect_kernel(slab_ref, prior_ref, scale_ref, out_ref):
    """Dense detect math on one (lane-tile, batch) block.

    slab_ref : VMEM [5+C, S, 128]  planes 0-3 box_pred (cx,cy,w,h), 4 conf, 5+ prob
    prior_ref: VMEM [4, S, 128]    priors (shared across batch)
    scale_ref: SMEM [4]            img_shape / (44, 16, 44, 16)
    out_ref  : VMEM [6, S, 128]    planes 0-3 corners (x1,y1,x2,y2) img-scaled,
                                   plane 4 max class score, plane 5 class (f32)
    """
    C = slab_ref.shape[0] - 5

    # Box decode: centers += priors, sizes *= priors, center/size -> corners.
    # Every operand is a dense [S, 128] plane -> full-vreg VALU, unmasked vst.
    cx = slab_ref[0] + prior_ref[0]
    cy = slab_ref[1] + prior_ref[1]
    half_w = slab_ref[2] * prior_ref[2] * 0.5
    half_h = slab_ref[3] * prior_ref[3] * 0.5

    # Combined grid-normalization + image-shape scaling via SMEM scalars.
    out_ref[0] = (cx - half_w) * scale_ref[0]
    out_ref[1] = (cy - half_h) * scale_ref[1]
    out_ref[2] = (cx + half_w) * scale_ref[2]
    out_ref[3] = (cy + half_h) * scale_ref[3]

    # Class scores = conf * prob ; per-box max / argmax as C-1 elementwise
    # max/select passes over dense planes (no cross-sublane XLU reduce).
    # Strict '>' keeps the FIRST max on ties (numpy argmax semantics).
    conf = slab_ref[4]
    best = conf * slab_ref[5]
    cls = jnp.zeros_like(best)
    for c in range(1, C):
        sc = conf * slab_ref[5 + c]
        better = sc > best
        cls = jnp.where(better, jnp.float32(c), cls)
        best = jnp.where(better, sc, best)
    out_ref[4] = best
    # Class count is tiny -> index exactly representable in f32; one aligned
    # f32 output slab keeps a single dense store stream.
    out_ref[5] = cls


def detect_pallas_core(box_pred, box_conf, box_prob, priors, img_shape):
    """Dense part of Detect_new.forward in a single Pallas call.

    Returns (corners [N,4] already img-scaled, scores [N], classes [N]),
    N = B*H*W, matching the PyTorch module's pre-filter values.
    """
    B, H, W, _ = box_pred.shape
    C = box_prob.shape[-1]
    HW = H * W
    feat = 5 + C
    f32 = jnp.float32

    # Split the flattened spatial axis into (groups, 128).  Small maps use a
    # single full-extent tile (second-minor block dim == full dim satisfies
    # the (8,128) rule); large maps tile with S a multiple of 8.
    G = (HW + 127) // 128
    if G <= _TARGET_S:
        S = G
        Gp = G
    else:
        S = _TARGET_S
        Gp = ((G + S - 1) // S) * S
    num_tiles = Gp // S
    Np = Gp * 128

    # Single packed input slab: one concat + one reshape/transpose/pad pass
    # (instead of four separate XLA transposes + four narrow DMAs).
    # TODO(synk): if the detection head is emitted channel-major (or bf16)
    # upstream, this transpose/cast pass disappears / halves.
    packed = jnp.concatenate(
        [box_pred.astype(f32), box_conf.astype(f32), box_prob.astype(f32)],
        axis=-1)                                                    # [B,H,W,feat]
    slab = jnp.transpose(jnp.reshape(packed, (B, HW, feat)), (0, 2, 1))
    slab = jnp.pad(slab, ((0, 0), (0, 0), (0, Np - HW)))            # [B,feat,Np]
    slab = slab.reshape(B, feat, Gp, 128)                           # free reshape

    # Priors: never materialize a batch broadcast; the shared prior block is
    # reused for every batch via an index_map that ignores the batch index,
    # and batch-innermost grid order keeps its block index constant across
    # consecutive steps (no per-batch re-DMA).
    PB = priors.shape[0]
    pr = jnp.transpose(jnp.reshape(priors.astype(f32), (PB, HW, 4)), (0, 2, 1))
    pr = jnp.pad(pr, ((0, 0), (0, 0), (0, Np - HW)))                # [PB,4,Np]
    pr = pr.reshape(PB, 4, Gp, 128)
    if PB == 1:
        pr = pr[0]                                                  # [4,Gp,128]
        prior_spec = pl.BlockSpec((4, S, 128), lambda t, b: (0, t, 0))
    else:  # per-batch priors (rare)
        prior_spec = pl.BlockSpec((None, 4, S, 128), lambda t, b: (b, 0, t, 0))

    # Combined scale folded once: img_shape / (44, 16, 44, 16), via SMEM.
    scale = (jnp.reshape(img_shape.astype(f32), (4,))
             / jnp.asarray(_GRID_DIV, f32))

    out = pl.pallas_call(
        _detect_kernel,
        out_shape=jax.ShapeDtypeStruct((B, 6, Gp, 128), f32),
        grid=(num_tiles, B),            # batch innermost -> prior block reuse
        in_specs=[
            pl.BlockSpec((None, feat, S, 128), lambda t, b: (b, 0, t, 0)),
            prior_spec,
            pl.BlockSpec(memory_space=pltpu.MemorySpace.SMEM),
        ],
        out_specs=pl.BlockSpec((None, 6, S, 128), lambda t, b: (b, 0, t, 0)),
        compiler_params=pltpu.CompilerParams(
            dimension_semantics=("parallel", "parallel")),
    )(slab, pr, scale)

    out = out.reshape(B, 6, Np)[:, :, :HW]
    corners = jnp.transpose(out[:, 0:4, :], (0, 2, 1)).reshape(B * HW, 4)
    scores = out[:, 4, :].reshape(B * HW)
    classes = out[:, 5, :].astype(jnp.int32).reshape(B * HW)
    return corners, scores, classes


_detect_pallas_core_jit = jax.jit(detect_pallas_core)


# ---------------- host-side glue (data-dependent, no Pallas equivalent) ------

def nms_np(boxes, scores, overlap=0.5, top_k=200):
    keep = np.zeros(scores.shape[0], dtype=np.int64)
    if boxes.size == 0:
        return keep, 0
    x1, y1, x2, y2 = boxes[:, 0], boxes[:, 1], boxes[:, 2], boxes[:, 3]
    area = (x2 - x1) * (y2 - y1)
    idx = np.argsort(scores, kind="stable")
    idx = idx[-top_k:]
    count = 0
    while idx.size > 0:
        i = int(idx[-1])
        keep[count] = i
        count += 1
        if idx.size == 1:
            break
        idx = idx[:-1]
        xx1 = np.maximum(x1[idx], x1[i])
        yy1 = np.maximum(y1[idx], y1[i])
        xx2 = np.minimum(x2[idx], x2[i])
        yy2 = np.minimum(y2[idx], y2[i])
        w = np.clip(xx2 - xx1, 0.0, None)
        h = np.clip(yy2 - yy1, 0.0, None)
        inter = w * h
        rem_areas = area[idx]
        iou = inter / (area[i] + rem_areas - inter)
        idx = idx[iou <= overlap]
    return keep, count


def detect_forward(box_pred, box_conf, box_prob, priors, img_shape,
                   score_t=0.4, nms_t=0.4, top_k=200):
    corners, scores, classes = _detect_pallas_core_jit(
        box_pred, box_conf, box_prob, priors, img_shape)

    # Device-side top-k prefilter: the reference NMS only ever considers the
    # top_k highest-scoring boxes above the threshold, so taking the global
    # top-k first and thresholding after yields the identical candidate set
    # while shrinking the device->host transfer from B*HW to top_k rows.
    N = int(scores.shape[0])
    k = min(top_k, N)
    top_scores, top_idx = jax.lax.top_k(scores, k)
    top_corners = jnp.take(corners, top_idx, axis=0)
    top_classes = jnp.take(classes, top_idx, axis=0)
    jax.block_until_ready((top_corners, top_scores, top_classes))

    # TODO(synk): masked_select thresholding + sequential NMS have dynamic
    # shapes / trip counts; they stay host-side NumPy glue.
    corners_np = np.asarray(top_corners)     # [k, 4]  (already img-scaled)
    scores_np = np.asarray(top_scores)       # [k]
    classes_np = np.asarray(top_classes)     # [k]

    mask = scores_np > score_t
    boxes = corners_np[mask]
    sel_scores = scores_np[mask]
    sel_classes = classes_np[mask]
    if boxes.size == 0:
        return boxes, sel_scores, sel_classes

    keep, count = nms_np(boxes, sel_scores, overlap=nms_t, top_k=top_k)
    keep = keep[:count]
    return boxes[keep], sel_scores[keep], sel_classes[keep]


if __name__ == "__main__":
    key = jax.random.PRNGKey(0)
    k1, k2, k3, k4 = jax.random.split(key, 4)

    B, H, W, C = 2, 10, 30, 4
    box_pred = jax.random.uniform(k1, (B, H, W, 4), jnp.float32,
                                  minval=-0.5, maxval=0.5)
    box_conf = jax.random.uniform(k2, (B, H, W, 1), jnp.float32,
                                  minval=0.3, maxval=1.0)
    box_prob = jax.nn.softmax(
        3.0 * jax.random.normal(k3, (B, H, W, C), jnp.float32), axis=-1)
    priors = jax.random.uniform(k4, (1, H, W, 4), jnp.float32,
                                minval=0.5, maxval=2.0)
    img_shape = jnp.array([[300.0, 100.0, 300.0, 100.0]], dtype=jnp.float32)

    # Run the Pallas kernel once and check the dense math against NumPy.
    corners, scores, classes = detect_pallas_core(
        box_pred, box_conf, box_prob, priors, img_shape)
    jax.block_until_ready((corners, scores, classes))

    bp = np.asarray(box_pred)
    pr = np.asarray(jnp.broadcast_to(priors, box_pred.shape))
    cf = np.asarray(box_conf)
    pb = np.asarray(box_prob)
    scale_np = (np.asarray(img_shape).reshape(4)
                / np.asarray(_GRID_DIV, np.float32))
    xy = bp[..., 0:2] + pr[..., 0:2]
    wh = bp[..., 2:4] * pr[..., 2:4]
    ref_corners = np.concatenate([xy - wh * 0.5, xy + wh * 0.5], -1) * scale_np
    ref_scores_all = cf * pb
    ref_scores = ref_scores_all.max(-1)
    ref_classes = ref_scores_all.argmax(-1)

    np.testing.assert_allclose(np.asarray(corners),
                               ref_corners.reshape(-1, 4),
                               rtol=1e-5, atol=1e-4)
    np.testing.assert_allclose(np.asarray(scores),
                               ref_scores.reshape(-1),
                               rtol=1e-5, atol=1e-6)
    assert np.array_equal(np.asarray(classes), ref_classes.reshape(-1))

    # Full forward (kernel + device top-k prefilter + host filter/NMS).
    boxes, sel_scores, sel_classes = detect_forward(
        box_pred, box_conf, box_prob, priors, img_shape)
    assert boxes.ndim == 2 and boxes.shape[1] == 4
    assert sel_scores.shape[0] == boxes.shape[0] == sel_classes.shape[0]
    print("KERNEL_OK")
</pallas_src>

<mosaic_0001>
module attributes {stable_mosaic.version = 11 : i64} {
  func.func @_detect_kernel(%arg0: i32, %arg1: i32, %arg2: memref<1x9x3x128xf32, #tpu.memory_space<vmem>>, %arg3: memref<4x3x128xf32, #tpu.memory_space<vmem>>, %arg4: memref<4xf32, #tpu.memory_space<smem>>, %arg5: memref<1x6x3x128xf32, #tpu.memory_space<vmem>>) attributes {dimension_semantics = [#tpu.dimension_semantics<parallel>, #tpu.dimension_semantics<parallel>], iteration_bounds = array<i64: 1, 2>, scalar_prefetch = 0 : i64, scratch_operands = 0 : i64, tpu.core_type = #tpu.core_type<tc>, window_params = [{transform_indices = @transform_0, window_bounds = array<i64: 1, 9, 3, 128>}, {transform_indices = @transform_1, window_bounds = array<i64: 4, 3, 128>}, {transform_indices = @transform_2, window_bounds = array<i64: 4>}, {transform_indices = @transform_3, window_bounds = array<i64: 1, 6, 3, 128>}]} {
    %c0 = arith.constant 0 : index
    %c0_0 = arith.constant 0 : index
    %c0_1 = arith.constant 0 : index
    %c0_2 = arith.constant 0 : index
    %0 = vector.load %arg2[%c0, %c0_0, %c0_1, %c0_2] : memref<1x9x3x128xf32, #tpu.memory_space<vmem>>, vector<1x1x3x128xf32>
    %1 = vector.shape_cast %0 : vector<1x1x3x128xf32> to vector<3x128xf32>
    %c0_3 = arith.constant 0 : index
    %c0_4 = arith.constant 0 : index
    %c0_5 = arith.constant 0 : index
    %2 = vector.load %arg3[%c0_3, %c0_4, %c0_5] : memref<4x3x128xf32, #tpu.memory_space<vmem>>, vector<1x3x128xf32>
    %3 = vector.shape_cast %2 : vector<1x3x128xf32> to vector<3x128xf32>
    %4 = arith.addf %1, %3 : vector<3x128xf32>
    %c0_6 = arith.constant 0 : index
    %c1 = arith.constant 1 : index
    %c0_7 = arith.constant 0 : index
    %c0_8 = arith.constant 0 : index
    %5 = vector.load %arg2[%c0_6, %c1, %c0_7, %c0_8] : memref<1x9x3x128xf32, #tpu.memory_space<vmem>>, vector<1x1x3x128xf32>
    %6 = vector.shape_cast %5 : vector<1x1x3x128xf32> to vector<3x128xf32>
    %c1_9 = arith.constant 1 : index
    %c0_10 = arith.constant 0 : index
    %c0_11 = arith.constant 0 : index
    %7 = vector.load %arg3[%c1_9, %c0_10, %c0_11] : memref<4x3x128xf32, #tpu.memory_space<vmem>>, vector<1x3x128xf32>
    %8 = vector.shape_cast %7 : vector<1x3x128xf32> to vector<3x128xf32>
    %9 = arith.addf %6, %8 : vector<3x128xf32>
    %c0_12 = arith.constant 0 : index
    %c2 = arith.constant 2 : index
    %c0_13 = arith.constant 0 : index
    %c0_14 = arith.constant 0 : index
    %10 = vector.load %arg2[%c0_12, %c2, %c0_13, %c0_14] : memref<1x9x3x128xf32, #tpu.memory_space<vmem>>, vector<1x1x3x128xf32>
    %11 = vector.shape_cast %10 : vector<1x1x3x128xf32> to vector<3x128xf32>
    %c2_15 = arith.constant 2 : index
    %c0_16 = arith.constant 0 : index
    %c0_17 = arith.constant 0 : index
    %12 = vector.load %arg3[%c2_15, %c0_16, %c0_17] : memref<4x3x128xf32, #tpu.memory_space<vmem>>, vector<1x3x128xf32>
    %13 = vector.shape_cast %12 : vector<1x3x128xf32> to vector<3x128xf32>
    %14 = arith.mulf %11, %13 : vector<3x128xf32>
    %cst = arith.constant 5.000000e-01 : f32
    %15 = vector.broadcast %cst : f32 to vector<3x128xf32>
    %16 = arith.mulf %14, %15 : vector<3x128xf32>
    %c0_18 = arith.constant 0 : index
    %c3 = arith.constant 3 : index
    %c0_19 = arith.constant 0 : index
    %c0_20 = arith.constant 0 : index
    %17 = vector.load %arg2[%c0_18, %c3, %c0_19, %c0_20] : memref<1x9x3x128xf32, #tpu.memory_space<vmem>>, vector<1x1x3x128xf32>
    %18 = vector.shape_cast %17 : vector<1x1x3x128xf32> to vector<3x128xf32>
    %c3_21 = arith.constant 3 : index
    %c0_22 = arith.constant 0 : index
    %c0_23 = arith.constant 0 : index
    %19 = vector.load %arg3[%c3_21, %c0_22, %c0_23] : memref<4x3x128xf32, #tpu.memory_space<vmem>>, vector<1x3x128xf32>
    %20 = vector.shape_cast %19 : vector<1x3x128xf32> to vector<3x128xf32>
    %21 = arith.mulf %18, %20 : vector<3x128xf32>
    %cst_24 = arith.constant 5.000000e-01 : f32
    %22 = vector.broadcast %cst_24 : f32 to vector<3x128xf32>
    %23 = arith.mulf %21, %22 : vector<3x128xf32>
    %24 = arith.subf %4, %16 : vector<3x128xf32>
    %c0_25 = arith.constant 0 : index
    %25 = memref.load %arg4[%c0_25] : memref<4xf32, #tpu.memory_space<smem>>
    %26 = vector.broadcast %25 : f32 to vector<3x128xf32>
    %27 = arith.mulf %24, %26 : vector<3x128xf32>
    %c0_26 = arith.constant 0 : index
    %c0_27 = arith.constant 0 : index
    %c0_28 = arith.constant 0 : index
    %c0_29 = arith.constant 0 : index
    %28 = vector.load %arg5[%c0_26, %c0_27, %c0_28, %c0_29] : memref<1x6x3x128xf32, #tpu.memory_space<vmem>>, vector<1x1x3x128xf32>
    %29 = vector.shape_cast %28 : vector<1x1x3x128xf32> to vector<3x128xf32>
    %30 = vector.shape_cast %27 : vector<3x128xf32> to vector<1x1x3x128xf32>
    tpu.vector_store %arg5[%c0_26, %c0_27, %c0_28, %c0_29], %30 {strides = array<i32>} : memref<1x6x3x128xf32, #tpu.memory_space<vmem>>, vector<1x1x3x128xf32>,
    %31 = arith.subf %9, %23 : vector<3x128xf32>
    %c1_30 = arith.constant 1 : index
    %32 = memref.load %arg4[%c1_30] : memref<4xf32, #tpu.memory_space<smem>>
    %33 = vector.broadcast %32 : f32 to vector<3x128xf32>
    %34 = arith.mulf %31, %33 : vector<3x128xf32>
    %c0_31 = arith.constant 0 : index
    %c1_32 = arith.constant 1 : index
    %c0_33 = arith.constant 0 : index
    %c0_34 = arith.constant 0 : index
    %35 = vector.load %arg5[%c0_31, %c1_32, %c0_33, %c0_34] : memref<1x6x3x128xf32, #tpu.memory_space<vmem>>, vector<1x1x3x128xf32>
    %36 = vector.shape_cast %35 : vector<1x1x3x128xf32> to vector<3x128xf32>
    %37 = vector.shape_cast %34 : vector<3x128xf32> to vector<1x1x3x128xf32>
    tpu.vector_store %arg5[%c0_31, %c1_32, %c0_33, %c0_34], %37 {strides = array<i32>} : memref<1x6x3x128xf32, #tpu.memory_space<vmem>>, vector<1x1x3x128xf32>,
    %38 = arith.addf %4, %16 : vector<3x128xf32>
    %c2_35 = arith.constant 2 : index
    %39 = memref.load %arg4[%c2_35] : memref<4xf32, #tpu.memory_space<smem>>
    %40 = vector.broadcast %39 : f32 to vector<3x128xf32>
    %41 = arith.mulf %38, %40 : vector<3x128xf32>
    %c0_36 = arith.constant 0 : index
    %c2_37 = arith.constant 2 : index
    %c0_38 = arith.constant 0 : index
    %c0_39 = arith.constant 0 : index
    %42 = vector.load %arg5[%c0_36, %c2_37, %c0_38, %c0_39] : memref<1x6x3x128xf32, #tpu.memory_space<vmem>>, vector<1x1x3x128xf32>
    %43 = vector.shape_cast %42 : vector<1x1x3x128xf32> to vector<3x128xf32>
    %44 = vector.shape_cast %41 : vector<3x128xf32> to vector<1x1x3x128xf32>
    tpu.vector_store %arg5[%c0_36, %c2_37, %c0_38, %c0_39], %44 {strides = array<i32>} : memref<1x6x3x128xf32, #tpu.memory_space<vmem>>, vector<1x1x3x128xf32>,
    %45 = arith.addf %9, %23 : vector<3x128xf32>
    %c3_40 = arith.constant 3 : index
    %46 = memref.load %arg4[%c3_40] : memref<4xf32, #tpu.memory_space<smem>>
    %47 = vector.broadcast %46 : f32 to vector<3x128xf32>
    %48 = arith.mulf %45, %47 : vector<3x128xf32>
    %c0_41 = arith.constant 0 : index
    %c3_42 = arith.constant 3 : index
    %c0_43 = arith.constant 0 : index
    %c0_44 = arith.constant 0 : index
    %49 = vector.load %arg5[%c0_41, %c3_42, %c0_43, %c0_44] : memref<1x6x3x128xf32, #tpu.memory_space<vmem>>, vector<1x1x3x128xf32>
    %50 = vector.shape_cast %49 : vector<1x1x3x128xf32> to vector<3x128xf32>
    %51 = vector.shape_cast %48 : vector<3x128xf32> to vector<1x1x3x128xf32>
    tpu.vector_store %arg5[%c0_41, %c3_42, %c0_43, %c0_44], %51 {strides = array<i32>} : memref<1x6x3x128xf32, #tpu.memory_space<vmem>>, vector<1x1x3x128xf32>,
    %c0_45 = arith.constant 0 : index
    %c4 = arith.constant 4 : index
    %c0_46 = arith.constant 0 : index
    %c0_47 = arith.constant 0 : index
    %52 = vector.load %arg2[%c0_45, %c4, %c0_46, %c0_47] : memref<1x9x3x128xf32, #tpu.memory_space<vmem>>, vector<1x1x3x128xf32>
    %53 = vector.shape_cast %52 : vector<1x1x3x128xf32> to vector<3x128xf32>
    %c0_48 = arith.constant 0 : index
    %c5 = arith.constant 5 : index
    %c0_49 = arith.constant 0 : index
    %c0_50 = arith.constant 0 : index
    %54 = vector.load %arg2[%c0_48, %c5, %c0_49, %c0_50] : memref<1x9x3x128xf32, #tpu.memory_space<vmem>>, vector<1x1x3x128xf32>
    %55 = vector.shape_cast %54 : vector<1x1x3x128xf32> to vector<3x128xf32>
    %56 = arith.mulf %53, %55 : vector<3x128xf32>
    %cst_51 = arith.constant 0.000000e+00 : f32
    %57 = vector.broadcast %cst_51 : f32 to vector<3x128xf32>
    %c0_52 = arith.constant 0 : index
    %c6 = arith.constant 6 : index
    %c0_53 = arith.constant 0 : index
    %c0_54 = arith.constant 0 : index
    %58 = vector.load %arg2[%c0_52, %c6, %c0_53, %c0_54] : memref<1x9x3x128xf32, #tpu.memory_space<vmem>>, vector<1x1x3x128xf32>
    %59 = vector.shape_cast %58 : vector<1x1x3x128xf32> to vector<3x128xf32>
    %60 = arith.mulf %53, %59 : vector<3x128xf32>
    %61 = arith.cmpf ogt, %60, %56 : vector<3x128xf32>
    %cst_55 = arith.constant 1.000000e+00 : f32
    %62 = vector.broadcast %cst_55 : f32 to vector<3x128xf32>
    %63 = arith.select %61, %62, %57 : vector<3x128xi1>, vector<3x128xf32>
    %64 = arith.select %61, %60, %56 : vector<3x128xi1>, vector<3x128xf32>
    %c0_56 = arith.constant 0 : index
    %c7 = arith.constant 7 : index
    %c0_57 = arith.constant 0 : index
    %c0_58 = arith.constant 0 : index
    %65 = vector.load %arg2[%c0_56, %c7, %c0_57, %c0_58] : memref<1x9x3x128xf32, #tpu.memory_space<vmem>>, vector<1x1x3x128xf32>
    %66 = vector.shape_cast %65 : vector<1x1x3x128xf32> to vector<3x128xf32>
    %67 = arith.mulf %53, %66 : vector<3x128xf32>
    %68 = arith.cmpf ogt, %67, %64 : vector<3x128xf32>
    %cst_59 = arith.constant 2.000000e+00 : f32
    %69 = vector.broadcast %cst_59 : f32 to vector<3x128xf32>
    %70 = arith.select %68, %69, %63 : vector<3x128xi1>, vector<3x128xf32>
    %71 = arith.select %68, %67, %64 : vector<3x128xi1>, vector<3x128xf32>
    %c0_60 = arith.constant 0 : index
    %c8 = arith.constant 8 : index
    %c0_61 = arith.constant 0 : index
    %c0_62 = arith.constant 0 : index
    %72 = vector.load %arg2[%c0_60, %c8, %c0_61, %c0_62] : memref<1x9x3x128xf32, #tpu.memory_space<vmem>>, vector<1x1x3x128xf32>
    %73 = vector.shape_cast %72 : vector<1x1x3x128xf32> to vector<3x128xf32>
    %74 = arith.mulf %53, %73 : vector<3x128xf32>
    %75 = arith.cmpf ogt, %74, %71 : vector<3x128xf32>
    %cst_63 = arith.constant 3.000000e+00 : f32
    %76 = vector.broadcast %cst_63 : f32 to vector<3x128xf32>
    %77 = arith.select %75, %76, %70 : vector<3x128xi1>, vector<3x128xf32>
    %78 = arith.select %75, %74, %71 : vector<3x128xi1>, vector<3x128xf32>
    %c0_64 = arith.constant 0 : index
    %c4_65 = arith.constant 4 : index
    %c0_66 = arith.constant 0 : index
    %c0_67 = arith.constant 0 : index
    %79 = vector.load %arg5[%c0_64, %c4_65, %c0_66, %c0_67] : memref<1x6x3x128xf32, #tpu.memory_space<vmem>>, vector<1x1x3x128xf32>
    %80 = vector.shape_cast %79 : vector<1x1x3x128xf32> to vector<3x128xf32>
    %81 = vector.shape_cast %78 : vector<3x128xf32> to vector<1x1x3x128xf32>
    tpu.vector_store %arg5[%c0_64, %c4_65, %c0_66, %c0_67], %81 {strides = array<i32>} : memref<1x6x3x128xf32, #tpu.memory_space<vmem>>, vector<1x1x3x128xf32>,
    %c0_68 = arith.constant 0 : index
    %c5_69 = arith.constant 5 : index
    %c0_70 = arith.constant 0 : index
    %c0_71 = arith.constant 0 : index
    %82 = vector.load %arg5[%c0_68, %c5_69, %c0_70, %c0_71] : memref<1x6x3x128xf32, #tpu.memory_space<vmem>>, vector<1x1x3x128xf32>
    %83 = vector.shape_cast %82 : vector<1x1x3x128xf32> to vector<3x128xf32>
    %84 = vector.shape_cast %77 : vector<3x128xf32> to vector<1x1x3x128xf32>
    tpu.vector_store %arg5[%c0_68, %c5_69, %c0_70, %c0_71], %84 {strides = array<i32>} : memref<1x6x3x128xf32, #tpu.memory_space<vmem>>, vector<1x1x3x128xf32>,
    return
  }
  func.func @transform_0(%arg0: i32, %arg1: i32) -> (i32, i32, i32, i32) {
    %c0_i32 = arith.constant 0 : i32
    %c0_i32_0 = arith.constant 0 : i32
    %c0_i32_1 = arith.constant 0 : i32
    return %arg1, %c0_i32, %arg0, %c0_i32_0 : i32, i32, i32, i32
  }
  func.func @transform_1(%arg0: i32, %arg1: i32) -> (i32, i32, i32) {
    %c0_i32 = arith.constant 0 : i32
    %c0_i32_0 = arith.constant 0 : i32
    %c0_i32_1 = arith.constant 0 : i32
    return %c0_i32, %arg0, %c0_i32_0 : i32, i32, i32
  }
  func.func @transform_2(%arg0: i32, %arg1: i32) -> i32 {
    %c0_i32 = arith.constant 0 : i32
    %c0_i32_0 = arith.constant 0 : i32
    return %c0_i32 : i32
  }
  func.func @transform_3(%arg0: i32, %arg1: i32) -> (i32, i32, i32, i32) {
    %c0_i32 = arith.constant 0 : i32
    %c0_i32_0 = arith.constant 0 : i32
    %c0_i32_1 = arith.constant 0 : i32
    return %arg1, %c0_i32, %arg0, %c0_i32_0 : i32, i32, i32, i32
  }
}

</mosaic_0001>

<bundles_post_ra>
// kernel: tpu_custom_call.1
= control target key start
LH: loop header
LB: loop body
LE: loop exit
PB: predicated region body
PF: predicated region fallthrough
CT: control target
= control target key end

     0   :  { %8 = vsyncpa [#allocation3], 0  ;;  %s548_s12 = smov 0   ;;  %s550_s13 = smov 0   ;;  %s635_s0 = inlined_call_operand.vmem [shape: f32[2,9,3,128], index: 0, kind: input, shape index: {}]   ;;  %s636_s1 = inlined_call_operand.vmem [shape: f32[4,3,128], index: 1, kind: input, shape index: {}]   ;;  %s637_s2 = inlined_call_operand.vmem [shape: f32[4], index: 2, kind: input, shape index: {}]   ;;  %s638_s3 = inlined_call_operand.vmem [shape: f32[2,6,3,128], index: 3, kind: output, shape index: {}]  }
   0x1   :  { %s552_s14 = smov 0  }
   0x2 LB: > { %s414_s15 = sadd.s32 4294967295, %s524_s14   ;;  %s23_s16 = sadd.s32 1, %s520_s13  ;;  %s524_s14 = sphi %s552_s14, %s14_s14   ;;  %s520_s13 = sphi %s550_s13, %s642_s13   ;;  %s516_s12 = sphi %s548_s12, %s641_s12  }
   0x3   : > { %p24_p0 = scmp.ge.s32.totalorder %s23_s16, 2  ;;  %p416_p1 = scmp.ge.s32.totalorder %s524_s14, 1 }
   0x4   : > { %p134_p2 = scmp.lt.s32.totalorder %s524_s14, 3  ;;  %p573_p4 = scmp.eq.s32.totalorder %s414_s15, 0 }
   0x5   : > { %s644_s16 = smov (%p24_p0, %s23_s16), 0  ;;  %s154_s21 = sshll.u32 %s637_s2, 4  ;;  %s155_s21 = int_to_ptr.vmem [resolvable:$true] %s154_s21 }
   0x6   : > { %p569_p3 = pnand %p416_p1, %p134_p2  ;;  %s483_s22 = scalar_lea.vmem %s155_s21, 16 }
   0x7   : > { %p484_p7 = scmp.ne.s32.totalorder %s155_s21, %s483_s22  ;;  %p491_p11 = scmp.lt.s32.totalorder %s155_s21, %s155_s21 }
   0x8   : > { %p451_p5 = pneg %p569_p3  ;;  %p492_p12 = scmp.lt.s32.totalorder %s483_s22, %s483_s22 }
   0xa   : > { %p452_p6 = pnand %p573_p4, %p451_p5  ;;  %p493_p13 = por %p492_p12, %p491_p11 }
   0xc   : > { %p485_p8 = pneg %p452_p6 }
   0xe   : > { %p486_p9 = pnand %p485_p8, %p484_p7 }
  0x10   : > { %p487_p10 = pneg %p486_p9 }
  0x12   : > { %p494_p0 = pnand %p493_p13, %p487_p10 }
  0x14   : > { %497 = shalt.err (!%p494_p0)
}
  0x15   : > { %s526_s23 = smov [#allocation2]   ;;  %178 = sbr.rel (%p569_p3) target bundleno = 49 (0x31), region = 32 }
  0x16   : > { %454 = dma.vmem_to_smem (!%p452_p6), %s155_s21, 16, %s526_s23, [#allocation3]  }
  0x1c   : > { %511 = dma.done.wait (%p573_p4), [#allocation3], 16  }
  0x1d   : > { %513 = vsyncadd (%p573_p4), [#allocation3], 4294967280 }
  0x1e   : > { %184 = sfence }
  0x1f   : > { %p213_p1 = scmp.lt.s32.totalorder %s516_s12, 1  ;;  %s591_s24 = sld [smem:[#allocation2]]  ;;  %v234_v0 = vld [vmem:[%s636_s1] sm:$0x7]  ;;  %v427_v1 = vld [vmem:[%s636_s1 + $0x8] sm:$0x7] }
  0x20   : > { %s596_s25 = sld [smem:[#allocation2 + $0x1]]  ;;  %s598_s26 = sld [smem:[#allocation2 + $0x2]]  ;;  %v425_v2 = vld [vmem:[%s636_s1 + $0x4] sm:$0x7]  ;;  %v429_v3 = vld [vmem:[%s636_s1 + $0xc] sm:$0x7] }
  0x21   : > { %s646_s12 = smov (!%p213_p1, %s516_s12), 1  ;;  %s601_s28 = sld [smem:[#allocation2 + $0x3]]  ;;  %v527_v32 = vmov 0.0  }
  0x22   : > { %s445_s27 = smul.u32 36, %s646_s12 }
  0x23   : > { %s446_s17 = smul.u32 24, %s646_s12 }
  0x24   : > { %s220_s8 = scalar_lea.vmem %s635_s0, %s445_s27 }
  0x25   : > { %v233_v4 = vld [vmem:[%s220_s8] sm:$0x7]  ;;  %v426_v5 = vld [vmem:[%s220_s8 + $0x8] sm:$0x7]  ;;  %v424_v6 = vld [vmem:[%s220_s8 + $0x4] sm:$0x7]  ;;  %v255_v18 = vstv %s591_s24  ;;  %s232_s19 = scalar_lea.vmem %s638_s3, %s446_s17 }
  0x26   : > { %v235_v7 = vadd.f32 %v234_v0, %v233_v4  ;;  %v245_v8 = vmul.f32 %v427_v1, %v426_v5  ;;  %v428_v9 = vld [vmem:[%s220_s8 + $0xc] sm:$0x7]  ;;  %v436_v10 = vld [vmem:[%s220_s8 + $0x10] sm:$0x7]  ;;  %v437_v11 = vld [vmem:[%s220_s8 + $0x14] sm:$0x7]  ;;  %v240_v12 = vadd.f32 %v425_v2, %v424_v6  ;;  %v260_v23 = vstv %s596_s25 }
  0x27   : > { %v251_v13 = vmul.f32 %v429_v3, %v428_v9  ;;  %v280_v14 = vmul.f32 %v437_v11, %v436_v10  ;;  %v438_v15 = vld [vmem:[%s220_s8 + $0x18] sm:$0x7]  ;;  %v439_v16 = vld [vmem:[%s220_s8 + $0x1c] sm:$0x7]  ;;  %v440_v21 = vld [vmem:[%s220_s8 + $0x20] sm:$0x7]  ;;  %v266_v24 = vstv %s598_s26 }
  0x28   : > { %v246_v17 = vmul.f32 0.5, %v245_v8  ;;  %v283_v19 = vmul.f32 %v438_v15, %v436_v10  ;;  %v289_v20 = vmul.f32 %v439_v16, %v436_v10  ;;  %v272_v25 = vstv %s601_s28 }
  0x29   : > { %v252_v22 = vmul.f32 0.5, %v251_v13  ;;  %v295_v28 = vmul.f32 %v440_v21, %v436_v10 }
  0x2a   : > { %v253_v26 = vsub.f32 %v235_v7, %v246_v17  ;;  %v264_v27 = vadd.f32 %v246_v17, %v235_v7  ;;  %vm284_vm0 = vcmp.gt.f32.partialorder %v283_v19, %v280_v14 }
  0x2b   : > { %v258_v29 = vsub.f32 %v240_v12, %v252_v22  ;;  %v270_v30 = vadd.f32 %v252_v22, %v240_v12  ;;  %v286_v31 = vsel %vm284_vm0, %v283_v19, %v280_v14  ;;  %v285_v33 = vsel %vm284_vm0, 1.0, %v527_v32 }
  0x2c   : > { %v256_v34 = vmul.f32 %v255_v18, %v253_v26  ;;  %v267_v35 = vmul.f32 %v266_v24, %v264_v27  ;;  %vm290_vm1 = vcmp.gt.f32.partialorder %v289_v20, %v286_v31 }
  0x2d   : > { %v261_v36 = vmul.f32 %v260_v23, %v258_v29  ;;  %v273_v37 = vmul.f32 %v272_v25, %v270_v30  ;;  %v292_v38 = vsel %vm290_vm1, %v289_v20, %v286_v31  ;;  %v291_v39 = vsel %vm290_vm1, 2.0, %v285_v33 }
  0x2e   : > { %257 = vst [vmem:[%s232_s19] sm:$0x7] %v256_v34  ;;  %433 = vst [vmem:[%s232_s19 + $0x8] sm:$0x7] %v267_v35  ;;  %vm296_vm2 = vcmp.gt.f32.partialorder %v295_v28, %v292_v38 }
  0x2f   : > { %431 = vst [vmem:[%s232_s19 + $0x4] sm:$0x7] %v261_v36  ;;  %435 = vst [vmem:[%s232_s19 + $0xc] sm:$0x7] %v273_v37  ;;  %v298_v40 = vsel %vm296_vm2, %v295_v28, %v292_v38  ;;  %v297_v41 = vsel %vm296_vm2, 3.0, %v291_v39 }
  0x30   : > { %441 = vst [vmem:[%s232_s19 + $0x10] sm:$0x7] %v298_v40  ;;  %442 = vst [vmem:[%s232_s19 + $0x14] sm:$0x7] %v297_v41 }
  0x31 PF: > { %s14_s14 = sadd.s32 1, %s524_s14   ;;  %s641_s12 = smov %s520_s13 }
  0x32   : > { %p11_p2 = scmp.ge.s32.totalorder %s14_s14, 4   ;;  %s642_s13 = smov %s644_s16 }
  0x34   :  { %13 = sbr.rel (!%p11_p2) target bundleno = 2 (0x2), region = 86 }
  0x3b   :  { %330 = vsyncpa [#allocation3], 1 }
  0x3c   :  { %332 = vsyncpa [#allocation3 + $0x1], 1 }

</bundles_post_ra>
